<compile_context>
chip_gen: v6e
topology: v6e:2x2x1
jax: 0.10.0
libtpu: 0.0.40
codegen_flags: <defaults>
</compile_context>

<pallas_src>
import functools

import jax
import jax.numpy as jnp
from jax.experimental import pallas as pl
from jax.experimental.pallas import tpu as pltpu


# ----------------------------------------------------------------------------
# Hardware-aware sizing helpers
# ----------------------------------------------------------------------------
def _vmem_capacity_bytes():
    try:
        return int(pltpu.get_tpu_info().vmem_capacity_bytes)
    except Exception:
        return 64 * 1024 * 1024  # conservative fallback (v7x-sized)


_VMEM_CAP = _vmem_capacity_bytes()
# Leave headroom below physical VMEM (v7x: 64 MiB physical -> 48 MiB limit;
# v5e/v6e: 128 MiB physical -> 64 MiB limit).
_VMEM_LIMIT = min(64 * 1024 * 1024, (_VMEM_CAP * 3) // 4)
# Halve the streaming-tile preference on the smaller-VMEM generation (v7x).
_HW_TILE_PREF = 2048 if _VMEM_CAP >= 96 * 1024 * 1024 else 1024
_N_TILE_PREF = 128
_K_TILE_PREF = 512 if _VMEM_CAP >= 96 * 1024 * 1024 else 256


def _pick_tile(total, preferred, align):
    """Largest multiple of `align` that divides `total` and is <= preferred;
    falls back to the full extent (always a legal block shape)."""
    if total <= preferred:
        return total
    t = (preferred // align) * align
    while t >= align:
        if total % t == 0:
            return t
        t -= align
    return total


# ----------------------------------------------------------------------------
# Kernels
# ----------------------------------------------------------------------------
def _support_kernel(x_ref, wenc_ref, benc_ref, wcls_ref, bcls_ref,
                    out_ref, pooled_acc_ref, *, n_ch, hw_total, adj_scale):
    """Streaming pool + encoder + classifier.

    grid = (N // TN, HW // HW_TILE); HW axis is the reduction ("arbitrary").
      x_ref:      (TN, C, HW_TILE)   streamed tile (native dtype)
      wenc_ref:   (C, HIDDEN) f32    VMEM-resident (constant index_map)
      benc_ref:   (1, HIDDEN) f32
      wcls_ref:   (HIDDEN, OUT_PAD) f32
      bcls_ref:   (1, OUT_PAD) f32
      out_ref:    (TN, OUT_PAD) f32  lane-dense output tile
      pooled_acc_ref: (TN, C) f32    running pooled-sum accumulator (scratch)
      adj_scale:  static python float (1.0 on the matrix-adj path)
    """
    j = pl.program_id(1)

    @pl.when(j == 0)
    def _init():
        pooled_acc_ref[...] = jnp.zeros_like(pooled_acc_ref)

    # Pooling stage: accumulate the HW-tile sum in f32.
    x = x_ref[...].astype(jnp.float32)                    # (TN, C, HW_TILE)
    pooled_acc_ref[...] += jnp.sum(x, axis=2)             # (TN, C)

    @pl.when(j == pl.num_programs(1) - 1)
    def _finalize():
        pooled = pooled_acc_ref[...] * (1.0 / float(hw_total))   # (TN, C)

        # Encoder: contraction dim K == C is tiny (3), so use C VPU
        # broadcast-FMAs instead of wasting an MXU pass.
        feat = benc_ref[...]                                      # (1, HIDDEN)
        for k in range(n_ch):
            feat = feat + pooled[:, k:k + 1] * wenc_ref[k:k + 1, :]

        # Classifier on the MXU; output width padded to a lane-dense 128.
        support = jnp.dot(feat, wcls_ref[...],
                          preferred_element_type=jnp.float32) + bcls_ref[...]

        # Scalar-adjacency scaling, baked statically (skipped when == 1.0).
        if adj_scale != 1.0:
            support = support * adj_scale
        out_ref[...] = support


def _adj_matmul_kernel(adj_ref, sup_ref, out_ref, acc_ref):
    """Tiled dense adj @ support.  grid = (N // TM, N // TK)."""
    k = pl.program_id(1)

    @pl.when(k == 0)
    def _init():
        acc_ref[...] = jnp.zeros_like(acc_ref)

    acc_ref[...] += jnp.dot(adj_ref[...], sup_ref[...],
                            preferred_element_type=jnp.float32)

    @pl.when(k == pl.num_programs(1) - 1)
    def _fin():
        out_ref[...] = acc_ref[...]


# ----------------------------------------------------------------------------
# Wrapper
# ----------------------------------------------------------------------------
def image_graph_convolution(x_nchw, params, adj=1.0):
    """x_nchw: (N, C, H, W).  adj: python scalar or dense (N, N) array."""
    N, C, H, W = x_nchw.shape
    HW = H * W
    w_enc, b_enc, w_cls, b_cls = params
    hidden = w_enc.shape[1]
    out_dim = w_cls.shape[1]
    out_pad = ((out_dim + 127) // 128) * 128

    # Explicit dispatch on the static Python type (mirrors the PyTorch
    # isinstance check); array-like adj must be a dense (N, N) matrix.
    is_scalar_adj = isinstance(adj, (float, int))
    if not is_scalar_adj:
        adj_arr = jnp.asarray(adj, jnp.float32)
        if adj_arr.ndim != 2 or adj_arr.shape != (N, N):
            raise ValueError(
                f"matrix adjacency must be dense (N, N)=({N},{N}); "
                f"got shape {adj_arr.shape}")

    # Glue reshapes / padding (plain JAX, outside the kernels).  x keeps its
    # native dtype: no wrapper-side conversion pass, one HBM read total.
    x3 = x_nchw.reshape(N, C, HW)
    w_enc_f = w_enc.astype(jnp.float32)
    b_enc_f = b_enc.astype(jnp.float32).reshape(1, hidden)
    w_cls_p = jnp.zeros((hidden, out_pad), jnp.float32).at[:, :out_dim].set(
        w_cls.astype(jnp.float32))
    b_cls_p = jnp.zeros((1, out_pad), jnp.float32).at[:, :out_dim].set(
        b_cls.astype(jnp.float32).reshape(1, out_dim))
    adj_scale = float(adj) if is_scalar_adj else 1.0

    # ---- Stage 1: streaming pool + encoder + classifier ----------------
    tn = _pick_tile(N, _N_TILE_PREF, 8)
    hw_tile = _pick_tile(HW, _HW_TILE_PREF, 128)
    grid = (N // tn, HW // hw_tile)

    support_padded = pl.pallas_call(
        functools.partial(_support_kernel, n_ch=C, hw_total=HW,
                          adj_scale=adj_scale),
        out_shape=jax.ShapeDtypeStruct((N, out_pad), jnp.float32),
        grid=grid,
        in_specs=[
            pl.BlockSpec((tn, C, hw_tile), lambda i, j: (i, 0, j)),  # x stream
            pl.BlockSpec((C, hidden), lambda i, j: (0, 0)),          # w_enc
            pl.BlockSpec((1, hidden), lambda i, j: (0, 0)),          # b_enc
            pl.BlockSpec((hidden, out_pad), lambda i, j: (0, 0)),    # w_cls
            pl.BlockSpec((1, out_pad), lambda i, j: (0, 0)),         # b_cls
        ],
        out_specs=pl.BlockSpec((tn, out_pad), lambda i, j: (i, 0)),
        scratch_shapes=[pltpu.VMEM((tn, C), jnp.float32)],
        compiler_params=pltpu.CompilerParams(
            dimension_semantics=("parallel", "arbitrary"),
            vmem_limit_bytes=_VMEM_LIMIT),
    )(x3, w_enc_f, b_enc_f, w_cls_p, b_cls_p)

    if is_scalar_adj:
        return support_padded[:, :out_dim]

    # ---- Stage 2: tiled dense adj @ support -----------------------------
    tm = _pick_tile(N, 256, 8)
    tk = _pick_tile(N, _K_TILE_PREF, 128)
    grid2 = (N // tm, N // tk)

    out_padded = pl.pallas_call(
        _adj_matmul_kernel,
        out_shape=jax.ShapeDtypeStruct((N, out_pad), jnp.float32),
        grid=grid2,
        in_specs=[
            pl.BlockSpec((tm, tk), lambda i, k: (i, k)),        # adj tile
            pl.BlockSpec((tk, out_pad), lambda i, k: (k, 0)),   # support tile
        ],
        out_specs=pl.BlockSpec((tm, out_pad), lambda i, k: (i, 0)),
        scratch_shapes=[pltpu.VMEM((tm, out_pad), jnp.float32)],
        compiler_params=pltpu.CompilerParams(
            dimension_semantics=("parallel", "arbitrary"),
            vmem_limit_bytes=_VMEM_LIMIT),
    )(adj_arr, support_padded)

    return out_padded[:, :out_dim]


# ----------------------------------------------------------------------------
# Params + pure-JAX reference
# ----------------------------------------------------------------------------
def init_params(key, inchannel=3, out_dim=14, hidden=1024):
    k1, k2, k3, k4 = jax.random.split(key, 4)
    # encoder 1x1-conv weights, stored pre-transposed: (C, 1024)
    w_enc = (jax.random.normal(k1, (inchannel, hidden), jnp.float32)
             / jnp.sqrt(inchannel))
    b_enc = jax.random.normal(k2, (1, hidden), jnp.float32) * 0.01
    # classifier nn.Linear(1024, out_dim): weight^T -> (1024, out_dim)
    w_cls = (jax.random.normal(k3, (hidden, out_dim), jnp.float32)
             / jnp.sqrt(hidden))
    b_cls = jax.random.normal(k4, (1, out_dim), jnp.float32) * 0.01
    return w_enc, b_enc, w_cls, b_cls


def reference(x_nchw, params, adj=1.0):
    """Plain-JAX f32 reference matching the PyTorch forward."""
    w_enc, b_enc, w_cls, b_cls = params
    N, C, H, W = x_nchw.shape
    pooled = jnp.mean(x_nchw.reshape(N, C, H * W).astype(jnp.float32), axis=2)
    feat = pooled @ w_enc + b_enc
    support = feat @ w_cls + b_cls
    if isinstance(adj, (float, int)):
        return support * adj
    return jnp.asarray(adj, jnp.float32) @ support


# ----------------------------------------------------------------------------
if __name__ == "__main__":
    key = jax.random.PRNGKey(0)
    k_x, k_p, k_a = jax.random.split(key, 3)

    N, C, H, W = 8, 3, 16, 16
    out_dim = 14
    x = jax.random.normal(k_x, (N, C, H, W), jnp.float32)
    params = init_params(k_p, inchannel=C, out_dim=out_dim)

    # Kernel streams x in f32 and accumulates in f32 -> tight tolerance.
    ATOL = RTOL = 1e-4

    # scalar-adjacency path (module default adj=1.0; use 2.0 to exercise it)
    out_scalar = image_graph_convolution(x, params, adj=2.0)
    out_scalar = jax.block_until_ready(out_scalar)
    ref_scalar = reference(x, params, adj=2.0)
    assert out_scalar.shape == (N, out_dim)
    assert jnp.allclose(out_scalar, ref_scalar, atol=ATOL, rtol=RTOL), (
        float(jnp.max(jnp.abs(out_scalar - ref_scalar))))

    # default scalar path (adj == 1.0, scaling statically elided)
    out_one = image_graph_convolution(x, params, adj=1.0)
    out_one = jax.block_until_ready(out_one)
    ref_one = reference(x, params, adj=1.0)
    assert jnp.allclose(out_one, ref_one, atol=ATOL, rtol=RTOL), (
        float(jnp.max(jnp.abs(out_one - ref_one))))

    # matrix-adjacency path (dense stand-in for torch.spmm)
    adj_mat = jax.random.uniform(k_a, (N, N), jnp.float32)
    out_mat = image_graph_convolution(x, params, adj=adj_mat)
    out_mat = jax.block_until_ready(out_mat)
    ref_mat = reference(x, params, adj=adj_mat)
    assert out_mat.shape == (N, out_dim)
    assert jnp.allclose(out_mat, ref_mat, atol=ATOL, rtol=RTOL), (
        float(jnp.max(jnp.abs(out_mat - ref_mat))))

    print("KERNEL_OK")
</pallas_src>

<mosaic_0001>
module attributes {stable_mosaic.version = 11 : i64} {
  func.func @_support_kernel(%arg0: i32, %arg1: i32, %arg2: memref<8x3x256xf32, #tpu.memory_space<vmem>>, %arg3: memref<3x1024xf32, #tpu.memory_space<vmem>>, %arg4: memref<1x1024xf32, #tpu.memory_space<vmem>>, %arg5: memref<1024x128xf32, #tpu.memory_space<vmem>>, %arg6: memref<1x128xf32, #tpu.memory_space<vmem>>, %arg7: memref<8x128xf32, #tpu.memory_space<vmem>>, %arg8: memref<8x3xf32, #tpu.memory_space<vmem>>) attributes {dimension_semantics = [#tpu.dimension_semantics<parallel>, #tpu.dimension_semantics<arbitrary>], iteration_bounds = array<i64: 1, 1>, scalar_prefetch = 0 : i64, scratch_operands = 1 : i64, tpu.core_type = #tpu.core_type<tc>, window_params = [{transform_indices = @transform_0, window_bounds = array<i64: 8, 3, 256>}, {pipeline_mode = #tpu.pipeline_mode<synchronous>, transform_indices = @transform_1, window_bounds = array<i64: 3, 1024>}, {pipeline_mode = #tpu.pipeline_mode<synchronous>, transform_indices = @transform_2, window_bounds = array<i64: 1, 1024>}, {pipeline_mode = #tpu.pipeline_mode<synchronous>, transform_indices = @transform_3, window_bounds = array<i64: 1024, 128>}, {pipeline_mode = #tpu.pipeline_mode<synchronous>, transform_indices = @transform_4, window_bounds = array<i64: 1, 128>}, {transform_indices = @transform_5, window_bounds = array<i64: 8, 128>}]} {
    %c0_i32 = arith.constant 0 : i32
    %0 = arith.cmpi eq, %arg1, %c0_i32 : i32
    %1 = arith.extui %0 : i1 to i32
    %c0_i32_0 = arith.constant 0 : i32
    %2 = arith.cmpi ne, %1, %c0_i32_0 : i32
    scf.if %2 {
      %cst_9 = arith.constant 0.000000e+00 : f32
      %11 = vector.broadcast %cst_9 : f32 to vector<8x3xf32>
      %c0_10 = arith.constant 0 : index
      %c0_11 = arith.constant 0 : index
      %12 = vector.load %arg8[%c0_10, %c0_11] : memref<8x3xf32, #tpu.memory_space<vmem>>, vector<8x3xf32>
      tpu.vector_store %arg8[%c0_10, %c0_11], %11 {strides = array<i32>} : memref<8x3xf32, #tpu.memory_space<vmem>>, vector<8x3xf32>,
    } else {
    }
    %c0 = arith.constant 0 : index
    %c0_1 = arith.constant 0 : index
    %c0_2 = arith.constant 0 : index
    %3 = vector.load %arg2[%c0, %c0_1, %c0_2] : memref<8x3x256xf32, #tpu.memory_space<vmem>>, vector<8x3x256xf32>
    %c0_3 = arith.constant 0 : index
    %c0_4 = arith.constant 0 : index
    %4 = vector.load %arg8[%c0_3, %c0_4] : memref<8x3xf32, #tpu.memory_space<vmem>>, vector<8x3xf32>
    %cst = arith.constant dense<0.000000e+00> : vector<8x3xf32>
    %5 = vector.multi_reduction <add>, %3, %cst [2] : vector<8x3x256xf32> to vector<8x3xf32>
    %6 = arith.addf %4, %5 : vector<8x3xf32>
    %c0_5 = arith.constant 0 : index
    %c0_6 = arith.constant 0 : index
    %7 = vector.load %arg8[%c0_5, %c0_6] : memref<8x3xf32, #tpu.memory_space<vmem>>, vector<8x3xf32>
    tpu.vector_store %arg8[%c0_5, %c0_6], %6 {strides = array<i32>} : memref<8x3xf32, #tpu.memory_space<vmem>>, vector<8x3xf32>,
    %c0_i32_7 = arith.constant 0 : i32
    %8 = arith.cmpi eq, %arg1, %c0_i32_7 : i32
    %9 = arith.extui %8 : i1 to i32
    %c0_i32_8 = arith.constant 0 : i32
    %10 = arith.cmpi ne, %9, %c0_i32_8 : i32
    scf.if %10 {
      %c0_9 = arith.constant 0 : index
      %c0_10 = arith.constant 0 : index
      %11 = vector.load %arg8[%c0_9, %c0_10] : memref<8x3xf32, #tpu.memory_space<vmem>>, vector<8x3xf32>
      %cst_11 = arith.constant 3.906250e-03 : f32
      %12 = vector.broadcast %cst_11 : f32 to vector<8x3xf32>
      %13 = arith.mulf %11, %12 : vector<8x3xf32>
      %c0_12 = arith.constant 0 : index
      %c0_13 = arith.constant 0 : index
      %14 = vector.load %arg4[%c0_12, %c0_13] : memref<1x1024xf32, #tpu.memory_space<vmem>>, vector<1x1024xf32>
      %15 = vector.extract_strided_slice %13 {offsets = [0, 0], sizes = [8, 1], strides = [1, 1]} : vector<8x3xf32> to vector<8x1xf32>
      %c0_14 = arith.constant 0 : index
      %c0_15 = arith.constant 0 : index
      %16 = vector.load %arg3[%c0_14, %c0_15] : memref<3x1024xf32, #tpu.memory_space<vmem>>, vector<1x1024xf32>
      %17 = vector.broadcast %15 : vector<8x1xf32> to vector<8x1024xf32>
      %18 = vector.broadcast %16 : vector<1x1024xf32> to vector<8x1024xf32>
      %19 = arith.mulf %17, %18 : vector<8x1024xf32>
      %20 = vector.broadcast %14 : vector<1x1024xf32> to vector<8x1024xf32>
      %21 = arith.addf %20, %19 : vector<8x1024xf32>
      %22 = vector.extract_strided_slice %13 {offsets = [0, 1], sizes = [8, 1], strides = [1, 1]} : vector<8x3xf32> to vector<8x1xf32>
      %c1 = arith.constant 1 : index
      %c0_16 = arith.constant 0 : index
      %23 = vector.load %arg3[%c1, %c0_16] : memref<3x1024xf32, #tpu.memory_space<vmem>>, vector<1x1024xf32>
      %24 = vector.broadcast %22 : vector<8x1xf32> to vector<8x1024xf32>
      %25 = vector.broadcast %23 : vector<1x1024xf32> to vector<8x1024xf32>
      %26 = arith.mulf %24, %25 : vector<8x1024xf32>
      %27 = arith.addf %21, %26 : vector<8x1024xf32>
      %28 = vector.extract_strided_slice %13 {offsets = [0, 2], sizes = [8, 1], strides = [1, 1]} : vector<8x3xf32> to vector<8x1xf32>
      %c2 = arith.constant 2 : index
      %c0_17 = arith.constant 0 : index
      %29 = vector.load %arg3[%c2, %c0_17] : memref<3x1024xf32, #tpu.memory_space<vmem>>, vector<1x1024xf32>
      %30 = vector.broadcast %28 : vector<8x1xf32> to vector<8x1024xf32>
      %31 = vector.broadcast %29 : vector<1x1024xf32> to vector<8x1024xf32>
      %32 = arith.mulf %30, %31 : vector<8x1024xf32>
      %33 = arith.addf %27, %32 : vector<8x1024xf32>
      %c0_18 = arith.constant 0 : index
      %c0_19 = arith.constant 0 : index
      %34 = vector.load %arg5[%c0_18, %c0_19] : memref<1024x128xf32, #tpu.memory_space<vmem>>, vector<1024x128xf32>
      %cst_20 = arith.constant dense<0.000000e+00> : vector<8x128xf32>
      %35 = tpu.matmul %33, %34, %cst_20 {dimension_numbers = #tpu.dot_dimension_numbers<[1], [0], [0], [1], [0, 0, 1, 1], [], []>} : vector<8x1024xf32>, vector<1024x128xf32>, vector<8x128xf32> -> vector<8x128xf32>
      %c0_21 = arith.constant 0 : index
      %c0_22 = arith.constant 0 : index
      %36 = vector.load %arg6[%c0_21, %c0_22] : memref<1x128xf32, #tpu.memory_space<vmem>>, vector<1x128xf32>
      %37 = vector.broadcast %36 : vector<1x128xf32> to vector<8x128xf32>
      %38 = arith.addf %35, %37 : vector<8x128xf32>
      %cst_23 = arith.constant 2.000000e+00 : f32
      %39 = vector.broadcast %cst_23 : f32 to vector<8x128xf32>
      %40 = arith.mulf %38, %39 : vector<8x128xf32>
      %c0_24 = arith.constant 0 : index
      %c0_25 = arith.constant 0 : index
      %41 = vector.load %arg7[%c0_24, %c0_25] : memref<8x128xf32, #tpu.memory_space<vmem>>, vector<8x128xf32>
      tpu.vector_store %arg7[%c0_24, %c0_25], %40 {strides = array<i32>} : memref<8x128xf32, #tpu.memory_space<vmem>>, vector<8x128xf32>,
    } else {
    }
    return
  }
  func.func @transform_0(%arg0: i32, %arg1: i32) -> (i32, i32, i32) {
    %c0_i32 = arith.constant 0 : i32
    %c0_i32_0 = arith.constant 0 : i32
    return %arg0, %c0_i32, %arg1 : i32, i32, i32
  }
  func.func @transform_1(%arg0: i32, %arg1: i32) -> (i32, i32) {
    %c0_i32 = arith.constant 0 : i32
    %c0_i32_0 = arith.constant 0 : i32
    %c0_i32_1 = arith.constant 0 : i32
    return %c0_i32, %c0_i32_0 : i32, i32
  }
  func.func @transform_2(%arg0: i32, %arg1: i32) -> (i32, i32) {
    %c0_i32 = arith.constant 0 : i32
    %c0_i32_0 = arith.constant 0 : i32
    %c0_i32_1 = arith.constant 0 : i32
    return %c0_i32, %c0_i32_0 : i32, i32
  }
  func.func @transform_3(%arg0: i32, %arg1: i32) -> (i32, i32) {
    %c0_i32 = arith.constant 0 : i32
    %c0_i32_0 = arith.constant 0 : i32
    %c0_i32_1 = arith.constant 0 : i32
    return %c0_i32, %c0_i32_0 : i32, i32
  }
  func.func @transform_4(%arg0: i32, %arg1: i32) -> (i32, i32) {
    %c0_i32 = arith.constant 0 : i32
    %c0_i32_0 = arith.constant 0 : i32
    %c0_i32_1 = arith.constant 0 : i32
    return %c0_i32, %c0_i32_0 : i32, i32
  }
  func.func @transform_5(%arg0: i32, %arg1: i32) -> (i32, i32) {
    %c0_i32 = arith.constant 0 : i32
    %c0_i32_0 = arith.constant 0 : i32
    return %arg0, %c0_i32 : i32, i32
  }
}

</mosaic_0001>

<bundles_post_ra>
// kernel: tpu_custom_call.1
= control target key start
LH: loop header
LB: loop body
LE: loop exit
PB: predicated region body
PF: predicated region fallthrough
CT: control target
= control target key end

     0   :  { %10 = vsyncpa [#allocation4], 0  ;;  %s1250_s0 = inlined_call_operand.vmem [shape: f32[8,3,256], index: 0, kind: input, shape index: {}]   ;;  %s1251_s1 = inlined_call_operand.vmem [shape: f32[3,1024], index: 1, kind: input, shape index: {}]   ;;  %s1252_s2 = inlined_call_operand.vmem [shape: f32[1,1024], index: 2, kind: input, shape index: {}]   ;;  %s1253_s3 = inlined_call_operand.hbm [shape: f32[1024,128], index: 3, kind: input, shape index: {}]   ;;  %s1254_s4 = inlined_call_operand.vmem [shape: f32[1,128], index: 4, kind: input, shape index: {}]   ;;  %s1255_s5 = inlined_call_operand.hbm [shape: f32[8,128], index: 5, kind: output, shape index: {}]  }
   0x1   :  { %11 = vsyncpa [#allocation5], 0  ;;  %s1050_s18 = smov [#allocation3]  }
   0x2   :  { %s23_s19 = sshll.u32 %s1050_s18, 4  ;;  %s24_s19 = int_to_ptr.vmem [resolvable:$true] %s23_s19 }
   0x3   :  { %s1014_s20 = scalar_lea.vmem %s24_s19, 16384  ;;  %p1019_p1 = scmp.lt.s32.totalorder %s24_s19, %s24_s19 }
   0x4   :  { %p1015_p0 = scmp.ne.s32.totalorder %s24_s19, %s1014_s20  ;;  %p1020_p2 = scmp.lt.s32.totalorder %s1014_s20, %s1014_s20 }
   0x6   :  { %p1021_p3 = por %p1020_p2, %p1019_p1 }
   0x8   :  { %p1022_p4 = pnand %p1021_p3, %p1015_p0 }
   0xa   :  { %1025 = shalt.err (!%p1022_p4)
}
   0xb   :  { %s1051_s21 = smov 128   ;;  %s1052_s22 = smov 8  }
   0xc   :  { %29 = dma.hbm_to_vmem [thread:$0]  %s1253_s3, 16384, %s24_s19, [#allocation4], %s1051_s21, %s1051_s21, %s1052_s22  }
   0xd   :  { %1046 = dma.done.wait [#allocation4], 16384  }
   0xe   :  { %1047 = vsyncadd [#allocation4], 4294950912  ;;  %vm74_vm0 = vcmask 1042432   ;;  %v41_v0 = vld [vmem:[%s1250_s0] sm:$0x77]  ;;  %vm39_vm1 = vcmask 23552  }
   0xf   :  { %v43_v1 = vld [vmem:[%s1250_s0 + $0x10] sm:$0x77]  ;;  %v42_v2 = vld [vmem:[%s1250_s0 + $0x8] sm:$0x77]  ;;  %v58_v3 = vcombine.high %v41_v0, %v41_v0  ;;  %v75_v4 = vsel %vm74_vm0, %v41_v0, 0.0  ;;  %v1053_v40 = vmov 0.0  }
  0x10   :  { %v60_v5 = vcombine.high %v43_v1, %v43_v1  ;;  %v85_v6 = vsel %vm74_vm0, %v43_v1, 0.0  ;;  %v44_v7 = vld [vmem:[%s1250_s0 + $0x18] sm:$0x77]  ;;  %v45_v8 = vld [vmem:[%s1250_s0 + $0x20] sm:$0x77]  ;;  %v59_v9 = vcombine.high %v42_v2, %v42_v2  ;;  %v80_v10 = vsel %vm74_vm0, %v42_v2, 0.0 }
  0x11   :  { %v61_v11 = vcombine.high %v44_v7, %v44_v7  ;;  %v46_v12 = vld [vmem:[%s1250_s0 + $0x28] sm:$0x77]  ;;  %v76_v13 = vsel %vm74_vm0, %v58_v3, 0.0  ;;  %v90_v15 = vsel %vm74_vm0, %v44_v7, 0.0  ;;  %v62_v16 = vcombine.high %v45_v8, %v45_v8  ;;  %v47_v21 = vld [vmem:[%s1250_s0 + $0x30] sm:$0x77] }
  0x12   :  { %v86_v14 = vsel %vm74_vm0, %v60_v5, 0.0  ;;  %v77_v17 = vadd.f32 %v76_v13, %v75_v4  ;;  %v81_v19 = vsel %vm74_vm0, %v59_v9, 0.0  ;;  %v48_v22 = vld [vmem:[%s1250_s0 + $0x38] sm:$0x77]  ;;  %v63_v23 = vcombine.high %v46_v12, %v46_v12  ;;  %40 = vst.msk [vmem:[#allocation2] sm:$0xff] %vm39_vm1, %v1053_v40  ;;  %v442_v43 = vld [vmem:[#allocation3 + $0xf8] sm:$0xff] }
  0x13   :  { %v87_v18 = vadd.f32 %v86_v14, %v85_v6  ;;  %v91_v20 = vsel %vm74_vm0, %v61_v11, 0.0  ;;  %v82_v24 = vadd.f32 %v81_v19, %v80_v10  ;;  %v95_v26 = vsel %vm74_vm0, %v45_v8, 0.0  ;;  %v474_v44 = vld [vmem:[#allocation3 + $0x1f8] sm:$0xff]  ;;  %846 = vmatprep.subr.mxu0 %v442_v43  ;;  %v441_v47 = vld [vmem:[#allocation3 + $0xf0] sm:$0xff]  ;;  %v440_v51 = vld [vmem:[#allocation3 + $0xe8] sm:$0xff]  ;;  %s1057_s22 = smov [#allocation6]  }
  0x14   :  { %78 = vadd.xlane.f32.xlu0 %v77_v17  ;;  %v92_v25 = vadd.f32 %v91_v20, %v90_v15  ;;  %v96_v27 = vsel %vm74_vm0, %v62_v16, 0.0  ;;  %v100_v28 = vsel %vm74_vm0, %v46_v12, 0.0  ;;  %v101_v29 = vsel %vm74_vm0, %v63_v23, 0.0  ;;  %v426_v45 = vld [vmem:[#allocation3 + $0x78] sm:$0xff]  ;;  %881 = vmatprep.subr.mxu1 %v474_v44  ;;  %v473_v48 = vld [vmem:[#allocation3 + $0x1f0] sm:$0xff]  ;;  %v472_v52 = vld [vmem:[#allocation3 + $0x1e8] sm:$0xff] }
  0x15   :  { %88 = vadd.xlane.f32.xlu1 %v87_v18  ;;  %v64_v30 = vcombine.high %v47_v21, %v47_v21  ;;  %v65_v31 = vcombine.high %v48_v22, %v48_v22  ;;  %v97_v32 = vadd.f32 %v96_v27, %v95_v26  ;;  %v102_v33 = vadd.f32 %v101_v29, %v100_v28  ;;  %v458_v46 = vld [vmem:[#allocation3 + $0x178] sm:$0xff]  ;;  %v425_v49 = vld [vmem:[#allocation3 + $0x70] sm:$0xff]  ;;  %v424_v53 = vld [vmem:[#allocation3 + $0x68] sm:$0xff]  ;;  %s834_s23 = sshll.u32 %s1057_s22, 4  ;;  %s835_s23 = int_to_ptr.vmem [resolvable:$true] %s834_s23 }
  0x16   :  { %v105_v34 = vsel %vm74_vm0, %v47_v21, 0.0  ;;  %v110_v36 = vsel %vm74_vm0, %v48_v22, 0.0  ;;  %v1054_v41 = vmov 1   ;;  %v1055_v42 = vmov 0   ;;  %847 = vmatpush3.msra.mxu0 %v426_v45  ;;  %882 = vmatpush3.msra.mxu1 %v458_v46  ;;  %v457_v50 = vld [vmem:[#allocation3 + $0x170] sm:$0xff]  ;;  %v456_v54 = vld [vmem:[#allocation3 + $0x168] sm:$0xff]  ;;  %p1031_p6 = scmp.lt.s32.totalorder %s835_s23, %s835_s23 }
  0x17   :  { %v106_v35 = vsel %vm74_vm0, %v64_v30, 0.0  ;;  %v111_v37 = vsel %vm74_vm0, %v65_v31, 0.0  ;;  %995 = vset.pattern.permute.xlu1 %v1054_v41  ;;  %994 = vset.pattern.permute.xlu0 %v1055_v42  ;;  %v439_v55 = vld [vmem:[#allocation3 + $0xe0] sm:$0xff]  ;;  %v438_v59 = vld [vmem:[#allocation3 + $0xd8] sm:$0xff]  ;;  %v437_v63 = vld [vmem:[#allocation3 + $0xd0] sm:$0xff]  ;;  %vm157_vm2 = vcmask 1041409  }
  0x18   :  { %83 = vadd.xlane.f32.xlu0 %v82_v24  ;;  %v107_v38 = vadd.f32 %v106_v35, %v105_v34  ;;  %v112_v39 = vadd.f32 %v111_v37, %v110_v36  ;;  %848 = vmatprep.subr.mxu0 %v441_v47  ;;  %v471_v56 = vld [vmem:[#allocation3 + $0x1e0] sm:$0xff]  ;;  %v470_v60 = vld [vmem:[#allocation3 + $0x1d8] sm:$0xff]  ;;  %v469_v0 = vld [vmem:[#allocation3 + $0x1d0] sm:$0xff]  ;;  %vm159_vm3 = vcmask 1042434   ;;  %vm161_vm4 = vcmask 1043459   ;;  %s1026_s24 = scalar_lea.vmem %s835_s23, 128 }
  0x19   :  { %93 = vadd.xlane.f32.xlu1 %v92_v25  ;;  %883 = vmatprep.subr.mxu1 %v473_v48  ;;  %v423_v57 = vld [vmem:[#allocation3 + $0x60] sm:$0xff]  ;;  %v422_v61 = vld [vmem:[#allocation3 + $0x58] sm:$0xff]  ;;  %v421_v1 = vld [vmem:[#allocation3 + $0x50] sm:$0xff]  ;;  %v123_v25 = vlaneseq  ;;  %vm163_vm5 = vcmask 1044484   ;;  %vm165_vm6 = vcmask 1045509   ;;  %vm167_vm7 = vcmask 1046534   ;;  %p1027_p5 = scmp.ne.s32.totalorder %s835_s23, %s1026_s24  ;;  %p1032_p7 = scmp.lt.s32.totalorder %s1026_s24, %s1026_s24 }
  0x1a   :  { %849 = vmatpush3.msra.mxu0 %v425_v49  ;;  %884 = vmatpush3.msra.mxu1 %v457_v50  ;;  %v455_v58 = vld [vmem:[#allocation3 + $0x160] sm:$0xff]  ;;  %v454_v62 = vld [vmem:[#allocation3 + $0x158] sm:$0xff]  ;;  %v453_v2 = vld [vmem:[#allocation3 + $0x150] sm:$0xff]  ;;  %vm169_vm8 = vcmask 1047559  }
  0x1b   :  { %850 = vmatprep.subr.mxu0 %v440_v51  ;;  %885 = vmatprep.subr.mxu1 %v472_v52  ;;  %v436_v3 = vld [vmem:[#allocation3 + $0xc8] sm:$0xff]  ;;  %v435_v7 = vld [vmem:[#allocation3 + $0xc0] sm:$0xff]  ;;  %v434_v11 = vld [vmem:[#allocation3 + $0xb8] sm:$0xff]  ;;  %v124_v26 = vand.u32 127, %v123_v25  ;;  %v1132_v27 = vshrl.u32 %v123_v25, 7  ;;  %p1033_p8 = por %p1032_p7, %p1031_p6 }
  0x1c   :  { %98 = vadd.xlane.f32.xlu0 %v97_v32  ;;  %851 = vmatpush3.msra.mxu0 %v424_v53  ;;  %v468_v4 = vld [vmem:[#allocation3 + $0x1c8] sm:$0xff]  ;;  %v467_v8 = vld [vmem:[#allocation3 + $0x1c0] sm:$0xff]  ;;  %v466_v12 = vld [vmem:[#allocation3 + $0x1b8] sm:$0xff] }
  0x1d   :  { %103 = vadd.xlane.f32.xlu1 %v102_v33  ;;  %886 = vmatpush3.msra.mxu1 %v456_v54  ;;  %v420_v5 = vld [vmem:[#allocation3 + $0x48] sm:$0xff]  ;;  %v419_v9 = vld [vmem:[#allocation3 + $0x40] sm:$0xff]  ;;  %v418_v13 = vld [vmem:[#allocation3 + $0x38] sm:$0xff]  ;;  %v127_v30 = vsub.s32 %v124_v26, %v1132_v27  ;;  %p1034_p9 = pnand %p1033_p8, %p1027_p5 }
  0x1e   :  { %852 = vmatprep.subr.mxu0 %v439_v55  ;;  %887 = vmatprep.subr.mxu1 %v471_v56  ;;  %v452_v6 = vld [vmem:[#allocation3 + $0x148] sm:$0xff]  ;;  %v451_v10 = vld [vmem:[#allocation3 + $0x140] sm:$0xff]  ;;  %v450_v14 = vld [vmem:[#allocation3 + $0x138] sm:$0xff] }
  0x1f   :  { %853 = vmatpush3.msra.mxu0 %v423_v57  ;;  %888 = vmatpush3.msra.mxu1 %v455_v58  ;;  %v433_v15 = vld [vmem:[#allocation3 + $0xb0] sm:$0xff]  ;;  %v432_v19 = vld [vmem:[#allocation3 + $0xa8] sm:$0xff]  ;;  %v431_v23 = vld [vmem:[#allocation3 + $0xa0] sm:$0xff] }
  0x20   :  { %108 = vadd.xlane.f32.xlu0 %v107_v38  ;;  %854 = vmatprep.subr.mxu0 %v438_v59  ;;  %v465_v16 = vld [vmem:[#allocation3 + $0x1b0] sm:$0xff]  ;;  %v464_v20 = vld [vmem:[#allocation3 + $0x1a8] sm:$0xff]  ;;  %v463_v24 = vld [vmem:[#allocation3 + $0x1a0] sm:$0xff] }
  0x21   :  { %113 = vadd.xlane.f32.xlu1 %v112_v39  ;;  %889 = vmatprep.subr.mxu1 %v470_v60  ;;  %v417_v17 = vld [vmem:[#allocation3 + $0x30] sm:$0xff]  ;;  %v416_v21 = vld [vmem:[#allocation3 + $0x28] sm:$0xff]  ;;  %v49_v50 = vld [vmem:[#allocation2] sm:$0xff] }
  0x22   :  { %855 = vmatpush3.msra.mxu0 %v422_v61  ;;  %890 = vmatpush3.msra.mxu1 %v454_v62  ;;  %v449_v18 = vld [vmem:[#allocation3 + $0x130] sm:$0xff]  ;;  %v448_v22 = vld [vmem:[#allocation3 + $0x128] sm:$0xff]  ;;  %v415_v54 = vld [vmem:[#allocation3 + $0x20] sm:$0xff] }
  0x23   :  { %856 = vmatprep.subr.mxu0 %v437_v63  ;;  %891 = vmatprep.subr.mxu1 %v469_v0  ;;  %v447_v55 = vld [vmem:[#allocation3 + $0x120] sm:$0xff]  ;;  %v430_v56 = vld [vmem:[#allocation3 + $0x98] sm:$0xff]  ;;  %v429_v61 = vld [vmem:[#allocation3 + $0x90] sm:$0xff] }
  0x24   :  { %857 = vmatpush3.msra.mxu0 %v421_v1  ;;  %892 = vmatpush3.msra.mxu1 %v453_v2  ;;  %v462_v57 = vld [vmem:[#allocation3 + $0x198] sm:$0xff]  ;;  %v461_v62 = vld [vmem:[#allocation3 + $0x190] sm:$0xff]  ;;  %v428_v2 = vld [vmem:[#allocation3 + $0x88] sm:$0xff] }
  0x25   :  { %858 = vmatprep.subr.mxu0 %v436_v3  ;;  %893 = vmatprep.subr.mxu1 %v468_v4  ;;  %v414_v58 = vld [vmem:[#allocation3 + $0x18] sm:$0xff]  ;;  %v413_v0 = vld [vmem:[#allocation3 + $0x10] sm:$0xff]  ;;  %v460_v3 = vld [vmem:[#allocation3 + $0x188] sm:$0xff] }
  0x26   :  { %859 = vmatpush3.msra.mxu0 %v420_v5  ;;  %894 = vmatpush3.msra.mxu1 %v452_v6  ;;  %v446_v59 = vld [vmem:[#allocation3 + $0x118] sm:$0xff]  ;;  %v445_v1 = vld [vmem:[#allocation3 + $0x110] sm:$0xff]  ;;  %v412_v4 = vld [vmem:[#allocation3 + $0x8] sm:$0xff] }
  0x27   :  { %860 = vmatprep.subr.mxu0 %v435_v7  ;;  %895 = vmatprep.subr.mxu1 %v467_v8  ;;  %v444_v5 = vld [vmem:[#allocation3 + $0x108] sm:$0xff]  ;;  %v427_v6 = vld [vmem:[#allocation3 + $0x80] sm:$0xff] }
  0x28   :  { %861 = vmatpush3.msra.mxu0 %v419_v9  ;;  %896 = vmatpush3.msra.mxu1 %v451_v10  ;;  %v459_v7 = vld [vmem:[#allocation3 + $0x180] sm:$0xff]  ;;  %v1056_v10 = vmov 2  }
  0x29   :  { %862 = vmatprep.subr.mxu0 %v434_v11  ;;  %897 = vmatprep.subr.mxu1 %v466_v12  ;;  %v411_v8 = vld [vmem:[#allocation3] sm:$0xff]  ;;  %v506_v11 = vld [vmem:[#allocation3 + $0x2f8] sm:$0xff] }
  0x2a   :  { %863 = vmatpush3.msra.mxu0 %v418_v13  ;;  %898 = vmatpush3.msra.mxu1 %v450_v14  ;;  %v443_v9 = vld [vmem:[#allocation3 + $0x100] sm:$0xff]  ;;  %v538_v12 = vld [vmem:[#allocation3 + $0x3f8] sm:$0xff]  ;;  %v194_v13 = vsub.s32 1, %v1132_v27  ;;  %v202_v14 = vsub.s32 3, %v1132_v27 }
  0x2b   :  { %864 = vmatprep.subr.mxu0 %v433_v15  ;;  %899 = vmatprep.subr.mxu1 %v465_v16  ;;  %v1141_v15 = vld [vmem:[%s1251_s1] ss:$4 sm:$0xff]  ;;  %v1146_v16 = vld [vmem:[%s1251_s1 + $0x1] ss:$4 sm:$0xff] }
  0x2c   :  { %865 = vmatpush3.msra.mxu0 %v417_v17  ;;  %900 = vmatpush3.msra.mxu1 %v449_v18  ;;  %v190_v17 = vsub.s32 0, %v1132_v27  ;;  %v198_v18 = vsub.s32 2, %v1132_v27  ;;  %v203_v25 = vrot.slane %v1141_v15, %v202_v14  ;;  %v307_v26 = vrot.slane %v1146_v16, %v202_v14 }
  0x2d   :  { %866 = vmatprep.subr.mxu0 %v432_v19  ;;  %901 = vmatprep.subr.mxu1 %v464_v20  ;;  %v210_v19 = vsub.s32 5, %v1132_v27  ;;  %v1152_v20 = vsub.s32 7, %v1132_v27 }
  0x2e   :  { %867 = vmatpush3.msra.mxu0 %v416_v21  ;;  %902 = vmatpush3.msra.mxu1 %v448_v22  ;;  %v1157_v21 = vld [vmem:[%s1252_s2] sm:$0xff]  ;;  %v195_v22 = vrot.slane %v1141_v15, %v194_v13 }
  0x2f   :  { %868 = vmatprep.subr.mxu0 %v431_v23  ;;  %903 = vmatprep.subr.mxu1 %v463_v24  ;;  %v299_v23 = vrot.slane %v1146_v16, %v194_v13  ;;  %v1164_v24 = vld [vmem:[%s1251_s1 + $0x2] ss:$4 sm:$0xff] }
  0x30   :  { %869 = vmatpush3.msra.mxu0 %v415_v54  ;;  %904 = vmatpush3.msra.mxu1 %v447_v55 }
  0x31   :  { %870 = vmatprep.subr.mxu0 %v430_v56  ;;  %905 = vmatprep.subr.mxu1 %v462_v57 }
  0x32   :  { %871 = vmatpush3.msra.mxu0 %v414_v58  ;;  %906 = vmatpush3.msra.mxu1 %v446_v59 }
  0x33   :  { %872 = vmatprep.subr.mxu0 %v429_v61  ;;  %907 = vmatprep.subr.mxu1 %v461_v62 }
  0x34   :  { %873 = vmatpush3.msra.mxu0 %v413_v0  ;;  %908 = vmatpush3.msra.mxu1 %v445_v1 }
  0x35   :  { %874 = vmatprep.subr.mxu0 %v428_v2  ;;  %909 = vmatprep.subr.mxu1 %v460_v3 }
  0x36   :  { %875 = vmatpush3.msra.mxu0 %v412_v4  ;;  %910 = vmatpush3.msra.mxu1 %v444_v5 }
  0x37   :  { %876 = vmatprep.subr.mxu0 %v427_v6  ;;  %911 = vmatprep.subr.mxu1 %v459_v7 }
  0x38   :  { %877 = vmatpush3.msra.mxu0 %v411_v8  ;;  %912 = vmatpush3.msra.mxu1 %v443_v9 }
  0x39   :  { %916 = vmatprep.subr.mxu0 %v506_v11  ;;  %951 = vmatprep.subr.mxu1 %v538_v12 }
  0x9d   :  { %v79_v28 = vpop.xlane.xlu0 %78 }
  0x9e   :  { %v89_v29 = vpop.xlane.xlu1 %88  ;;  %v128_v33 = vrot.slane %v79_v28, %v127_v30  ;;  %v191_v28 = vrot.slane %v1141_v15, %v190_v17 }
  0x9f   :  { %v136_v36 = vrot.slane %v89_v29, %v127_v30  ;;  %v295_v29 = vrot.slane %v1146_v16, %v190_v17 }
  0xa1   :  { %v84_v31 = vpop.xlane.xlu0 %83 }
  0xa2   :  { %v94_v32 = vpop.xlane.xlu1 %93  ;;  %v132_v34 = vrot.slane %v84_v31, %v127_v30  ;;  %v303_v31 = vrot.slane %v1146_v16, %v198_v18 }
  0xa3   :  { %v140_v35 = vrot.slane %v94_v32, %v127_v30  ;;  %v211_v32 = vrot.slane %v1141_v15, %v210_v19 }
  0xa4   :  { %v158_v37 = vsel %vm157_vm2, %v132_v34, %v128_v33  ;;  %v315_v33 = vrot.slane %v1146_v16, %v210_v19  ;;  %v219_v34 = vrot.slane %v1141_v15, %v1152_v20 }
  0xa5   :  { %v160_v38 = vsel %vm159_vm3, %v136_v36, %v158_v37  ;;  %v99_v39 = vpop.xlane.xlu0 %98  ;;  %v362_v36 = vrot.slane %v1164_v24, %v194_v13  ;;  %v252_v37 = vrot.slane %v1157_v21, %v202_v14 }
  0xa6   :  { %v104_v40 = vpop.xlane.xlu1 %103  ;;  %v162_v41 = vsel %vm161_vm4, %v140_v35, %v160_v38  ;;  %v144_v42 = vrot.slane %v99_v39, %v127_v30  ;;  %v244_v35 = vrot.slane %v1157_v21, %v194_v13  ;;  %v240_v38 = vrot.slane %v1157_v21, %v190_v17 }
  0xa7   :  { %v148_v43 = vrot.slane %v104_v40, %v127_v30  ;;  %v370_v39 = vrot.slane %v1164_v24, %v202_v14  ;;  %v358_v40 = vrot.slane %v1164_v24, %v190_v17 }
  0xa8   :  { %v164_v44 = vsel %vm163_vm5, %v144_v42, %v162_v41  ;;  %v248_v41 = vrot.slane %v1157_v21, %v198_v18  ;;  %v366_v42 = vrot.slane %v1164_v24, %v198_v18 }
  0xa9   :  { %v109_v45 = vpop.xlane.xlu0 %108  ;;  %v166_v49 = vsel %vm165_vm6, %v148_v43, %v164_v44 }
  0xaa   :  { %v114_v46 = vpop.xlane.xlu1 %113  ;;  %v152_v47 = vrot.slane %v109_v45, %v127_v30  ;;  %v260_v45 = vrot.slane %v1157_v21, %v210_v19 }
  0xab   :  { %v156_v48 = vrot.slane %v114_v46, %v127_v30  ;;  %v199_v30 = vrot.slane %v1141_v15, %v198_v18  ;;  %v378_v46 = vrot.slane %v1164_v24, %v210_v19 }
  0xac   :  { %v168_v51 = vsel %vm167_vm7, %v152_v47, %v166_v49  ;;  %v268_v47 = vrot.slane %v1157_v21, %v1152_v20 }
  0xad   :  { %v170_v52 = vsel %vm169_vm8, %v156_v48, %v168_v51  ;;  %v323_v48 = vrot.slane %v1146_v16, %v1152_v20 }
  0xae   :  { %v172_v53 = vadd.f32 %v170_v52, %v49_v50  ;;  %v386_v52 = vrot.slane %v1164_v24, %v1152_v20 }
  0xb0   :  { %174 = vst.msk [vmem:[#allocation2] sm:$0xff] %vm39_vm1, %v172_v53 }
  0xb7   :  { %v178_v60 = vld [vmem:[#allocation2] sm:$0xff] }
  0xb8   :  { %v179_v63 = vmul.f32 0.00390625, %v178_v60 }
  0xba   :  { %288 = vperm.xlu1 %995, %v179_v63   ;;  %184 = vperm.xlu0 %994, %v179_v63  }
  0xbe   :  { %996 = vset.pattern.permute.xlu1 %v1056_v10  ;;  %997 = vset.pattern.permute.xlu0 %v1056_v10 }
  0xbf   :  { %351 = vperm.xlu1 %996, %v179_v63  }
 0x135   :  { %v1184_v43 = vpop.permute.xlu1 %288  ;;  %v1186_v44 = vpop.permute.xlu0 %184 }
 0x136   :  { %v229_v49 = vmul.f32 %v195_v22, %v1186_v44  ;;  %v333_v50 = vmul.f32 %v299_v23, %v1184_v43  ;;  %v231_v51 = vmul.f32 %v203_v25, %v1186_v44  ;;  %v335_v53 = vmul.f32 %v307_v26, %v1184_v43  ;;  %v490_v22 = vld [vmem:[#allocation3 + $0x278] sm:$0xff]  ;;  %v505_v26 = vld [vmem:[#allocation3 + $0x2f0] sm:$0xff] }
 0x137   :  { %v228_v54 = vmul.f32 %v191_v28, %v1186_v44  ;;  %v332_v55 = vmul.f32 %v295_v29, %v1184_v43  ;;  %v230_v56 = vmul.f32 %v199_v30, %v1186_v44  ;;  %v334_v59 = vmul.f32 %v303_v31, %v1184_v43  ;;  %v522_v23 = vld [vmem:[#allocation3 + $0x378] sm:$0xff]  ;;  %v537_v30 = vld [vmem:[#allocation3 + $0x3f0] sm:$0xff] }
 0x138   :  { %v278_v57 = vadd.f32 %v244_v35, %v229_v49  ;;  %v280_v58 = vadd.f32 %v252_v37, %v231_v51  ;;  %v233_v60 = vmul.f32 %v211_v32, %v1186_v44  ;;  %v337_v63 = vmul.f32 %v315_v33, %v1184_v43  ;;  %v489_v32 = vld [vmem:[#allocation3 + $0x270] sm:$0xff]  ;;  %v536_v35 = vld [vmem:[#allocation3 + $0x3e8] sm:$0xff] }
 0x139   :  { %v277_v61 = vadd.f32 %v240_v38, %v228_v54  ;;  %v279_v62 = vadd.f32 %v248_v41, %v230_v56  ;;  %v235_v0 = vmul.f32 %v219_v34, %v1186_v44  ;;  %v339_v5 = vmul.f32 %v323_v48, %v1184_v43  ;;  %v521_v33 = vld [vmem:[#allocation3 + $0x370] sm:$0xff]  ;;  %v504_v34 = vld [vmem:[#allocation3 + $0x2e8] sm:$0xff]  ;;  %v503_v38 = vld [vmem:[#allocation3 + $0x2e0] sm:$0xff] }
 0x13a   :  { %v1207_v1 = vpop.permute.xlu1 %351  ;;  %v341_v2 = vadd.f32 %v333_v50, %v278_v57  ;;  %v343_v3 = vadd.f32 %v335_v53, %v280_v58  ;;  %v282_v4 = vadd.f32 %v260_v45, %v233_v60  ;;  %v520_v37 = vld [vmem:[#allocation3 + $0x368] sm:$0xff]  ;;  %v519_v41 = vld [vmem:[#allocation3 + $0x360] sm:$0xff]  ;;  %v534_v45 = vld [vmem:[#allocation3 + $0x3d8] sm:$0xff]  ;;  %v1217_v56 = vsub.s32 4, %v1132_v27 }
 0x13b   :  { %v396_v6 = vmul.f32 %v362_v36, %v1207_v1  ;;  %v398_v7 = vmul.f32 %v370_v39, %v1207_v1  ;;  %v340_v8 = vadd.f32 %v332_v55, %v277_v61  ;;  %v395_v9 = vmul.f32 %v358_v40, %v1207_v1  ;;  %v488_v36 = vld [vmem:[#allocation3 + $0x268] sm:$0xff]  ;;  %v535_v39 = vld [vmem:[#allocation3 + $0x3e0] sm:$0xff]  ;;  %v501_v48 = vld [vmem:[#allocation3 + $0x2d0] sm:$0xff] }
 0x13c   :  { %v342_v10 = vadd.f32 %v334_v59, %v279_v62  ;;  %v397_v11 = vmul.f32 %v366_v42, %v1207_v1  ;;  %v345_v12 = vadd.f32 %v337_v63, %v282_v4  ;;  %v400_v13 = vmul.f32 %v378_v46, %v1207_v1  ;;  %v487_v40 = vld [vmem:[#allocation3 + $0x260] sm:$0xff]  ;;  %v502_v42 = vld [vmem:[#allocation3 + $0x2d8] sm:$0xff]  ;;  %v533_v49 = vld [vmem:[#allocation3 + $0x3d0] sm:$0xff] }
 0x13d   :  { %v404_v14 = vadd.f32 %v396_v6, %v341_v2  ;;  %v406_v17 = vadd.f32 %v398_v7, %v343_v3  ;;  %v403_v18 = vadd.f32 %v395_v9, %v340_v8  ;;  %v284_v19 = vadd.f32 %v268_v47, %v235_v0  ;;  %v486_v46 = vld [vmem:[#allocation3 + $0x258] sm:$0xff]  ;;  %v485_v50 = vld [vmem:[#allocation3 + $0x250] sm:$0xff]  ;;  %v532_v53 = vld [vmem:[#allocation3 + $0x3c8] sm:$0xff] }
 0x13e   :  { %v405_v20 = vadd.f32 %v397_v11, %v342_v10  ;;  %v402_v25 = vmul.f32 %v386_v52, %v1207_v1  ;;  %v408_v29 = vadd.f32 %v400_v13, %v345_v12  ;;  %v518_v47 = vld [vmem:[#allocation3 + $0x358] sm:$0xff]  ;;  %v517_v51 = vld [vmem:[#allocation3 + $0x350] sm:$0xff]  ;;  %v500_v52 = vld [vmem:[#allocation3 + $0x2c8] sm:$0xff]  ;;  %v1220_v57 = vsub.s32 6, %v1132_v27 }
 0x13f   :  { %610 = vmatprep.mubr.f32.mxu0 %v404_v14  ;;  %680 = vmatprep.mubr.f32.mxu1 %v406_v17  ;;  %v347_v28 = vadd.f32 %v339_v5, %v284_v19  ;;  %v484_v54 = vld [vmem:[#allocation3 + $0x248] sm:$0xff]  ;;  %v499_v58 = vld [vmem:[#allocation3 + $0x2c0] sm:$0xff]  ;;  %v498_v62 = vld [vmem:[#allocation3 + $0x2b8] sm:$0xff]  ;;  %v207_v27 = vrot.slane %v1141_v15, %v1217_v56  ;;  %v256_v10 = vrot.slane %v1157_v21, %v1217_v56 }
 0x140   :  { %611 = vmatmul.mubr.f32.vlgmr.msra.gmra.mxu0 %v403_v18  ;;  %681 = vmatmul.mubr.f32.vlgmr.msra.gmra.mxu1 %v405_v20  ;;  %v516_v55 = vld [vmem:[#allocation3 + $0x348] sm:$0xff]  ;;  %v531_v59 = vld [vmem:[#allocation3 + $0x3c0] sm:$0xff]  ;;  %v530_v63 = vld [vmem:[#allocation3 + $0x3b8] sm:$0xff]  ;;  %v215_v3 = vrot.slane %v1141_v15, %v1220_v57  ;;  %v264_v14 = vrot.slane %v1157_v21, %v1220_v57  ;;  %v374_v21 = vrot.slane %v1164_v24, %v1217_v56 }
 0x141   :  { %917 = vmatpush3.msra.mxu0 %v490_v22  ;;  %952 = vmatpush3.msra.mxu1 %v522_v23  ;;  %v410_v31 = vadd.f32 %v402_v25, %v347_v28  ;;  %v483_v60 = vld [vmem:[#allocation3 + $0x240] sm:$0xff]  ;;  %v482_v0 = vld [vmem:[#allocation3 + $0x238] sm:$0xff]  ;;  %v497_v4 = vld [vmem:[#allocation3 + $0x2b0] sm:$0xff]  ;;  %v232_v15 = vmul.f32 %v207_v27, %v1186_v44  ;;  %v311_v22 = vrot.slane %v1146_v16, %v1217_v56 }
 0x142   :  { %918 = vmatprep.subr.mxu0 %v505_v26  ;;  %750 = vmatprep.mubr.f32.mxu0 %v408_v29  ;;  %v515_v61 = vld [vmem:[#allocation3 + $0x340] sm:$0xff]  ;;  %v514_v2 = vld [vmem:[#allocation3 + $0x338] sm:$0xff]  ;;  %v529_v5 = vld [vmem:[#allocation3 + $0x3b0] sm:$0xff]  ;;  %v234_v13 = vmul.f32 %v215_v3, %v1186_v44  ;;  %v319_v23 = vrot.slane %v1146_v16, %v1220_v57 }
 0x143   :  { %953 = vmatprep.subr.mxu1 %v537_v30  ;;  %820 = vmatprep.mubr.f32.mxu1 %v410_v31  ;;  %v481_v6 = vld [vmem:[#allocation3 + $0x230] sm:$0xff]  ;;  %v496_v8 = vld [vmem:[#allocation3 + $0x2a8] sm:$0xff]  ;;  %v495_v17 = vld [vmem:[#allocation3 + $0x2a0] sm:$0xff]  ;;  %v281_v29 = vadd.f32 %v256_v10, %v232_v15  ;;  %v382_v31 = vrot.slane %v1164_v24, %v1220_v57 }
 0x144   :  { %919 = vmatpush3.msra.mxu0 %v489_v32  ;;  %954 = vmatpush3.msra.mxu1 %v521_v33  ;;  %v513_v7 = vld [vmem:[#allocation3 + $0x330] sm:$0xff]  ;;  %v528_v9 = vld [vmem:[#allocation3 + $0x3a8] sm:$0xff]  ;;  %v527_v18 = vld [vmem:[#allocation3 + $0x3a0] sm:$0xff]  ;;  %v283_v30 = vadd.f32 %v264_v14, %v234_v13 }
 0x145   :  { %920 = vmatprep.subr.mxu0 %v504_v34  ;;  %955 = vmatprep.subr.mxu1 %v536_v35  ;;  %v480_v11 = vld [vmem:[#allocation3 + $0x228] sm:$0xff]  ;;  %v479_v19 = vld [vmem:[#allocation3 + $0x220] sm:$0xff]  ;;  %v494_v44 = vld [vmem:[#allocation3 + $0x298] sm:$0xff]  ;;  %v336_v35 = vmul.f32 %v311_v22, %v1184_v43 }
 0x146   :  { %921 = vmatpush3.msra.mxu0 %v488_v36  ;;  %956 = vmatpush3.msra.mxu1 %v520_v37  ;;  %v512_v12 = vld [vmem:[#allocation3 + $0x328] sm:$0xff]  ;;  %v511_v20 = vld [vmem:[#allocation3 + $0x320] sm:$0xff]  ;;  %v526_v25 = vld [vmem:[#allocation3 + $0x398] sm:$0xff]  ;;  %v338_v36 = vmul.f32 %v319_v23, %v1184_v43 }
 0x147   :  { %922 = vmatprep.subr.mxu0 %v503_v38  ;;  %957 = vmatprep.subr.mxu1 %v535_v39  ;;  %v478_v26 = vld [vmem:[#allocation3 + $0x218] sm:$0xff]  ;;  %v493_v32 = vld [vmem:[#allocation3 + $0x290] sm:$0xff]  ;;  %v492_v37 = vld [vmem:[#allocation3 + $0x288] sm:$0xff]  ;;  %v399_v39 = vmul.f32 %v374_v21, %v1207_v1 }
 0x148   :  { %923 = vmatpush3.msra.mxu0 %v487_v40  ;;  %958 = vmatpush3.msra.mxu1 %v519_v41  ;;  %v510_v28 = vld [vmem:[#allocation3 + $0x318] sm:$0xff]  ;;  %v525_v16 = vld [vmem:[#allocation3 + $0x390] sm:$0xff]  ;;  %v524_v38 = vld [vmem:[#allocation3 + $0x388] sm:$0xff]  ;;  %v344_v41 = vadd.f32 %v336_v35, %v281_v29 }
 0x149   :  { %924 = vmatprep.subr.mxu0 %v502_v42  ;;  %959 = vmatprep.subr.mxu1 %v534_v45  ;;  %v477_v33 = vld [vmem:[#allocation3 + $0x210] sm:$0xff]  ;;  %v476_v24 = vld [vmem:[#allocation3 + $0x208] sm:$0xff]  ;;  %v346_v42 = vadd.f32 %v338_v36, %v283_v30  ;;  %v401_v45 = vmul.f32 %v382_v31, %v1207_v1  ;;  %v475_v43 = vld [vmem:[#allocation3 + $0x200] sm:$0xff] }
 0x14a   :  { %925 = vmatpush3.msra.mxu0 %v486_v46  ;;  %960 = vmatpush3.msra.mxu1 %v518_v47  ;;  %v509_v34 = vld [vmem:[#allocation3 + $0x310] sm:$0xff]  ;;  %v508_v40 = vld [vmem:[#allocation3 + $0x308] sm:$0xff]  ;;  %v491_v46 = vld [vmem:[#allocation3 + $0x280] sm:$0xff] }
 0x14b   :  { %926 = vmatprep.subr.mxu0 %v501_v48  ;;  %961 = vmatprep.subr.mxu1 %v533_v49  ;;  %v523_v47 = vld [vmem:[#allocation3 + $0x380] sm:$0xff]  ;;  %v407_v49 = vadd.f32 %v399_v39, %v344_v41 }
 0x14c   :  { %927 = vmatpush3.msra.mxu0 %v485_v50  ;;  %962 = vmatpush3.msra.mxu1 %v517_v51  ;;  %v507_v48 = vld [vmem:[#allocation3 + $0x300] sm:$0xff]  ;;  %v409_v50 = vadd.f32 %v401_v45, %v346_v42 }
 0x14d   :  { %928 = vmatprep.subr.mxu0 %v500_v52  ;;  %963 = vmatprep.subr.mxu1 %v532_v53 }
 0x14e   :  { %929 = vmatpush3.msra.mxu0 %v484_v54  ;;  %964 = vmatpush3.msra.mxu1 %v516_v55  ;;  %v845_v54 = vld [vmem:[%s1254_s4] ss:$0 sm:$0xff] }
 0x14f   :  { %930 = vmatprep.subr.mxu0 %v499_v58  ;;  %965 = vmatprep.subr.mxu1 %v531_v59 }
 0x150   :  { %931 = vmatpush3.msra.mxu0 %v483_v60  ;;  %966 = vmatpush3.msra.mxu1 %v515_v61 }
 0x151   :  { %932 = vmatprep.subr.mxu0 %v498_v62  ;;  %967 = vmatprep.subr.mxu1 %v530_v63 }
 0x152   :  { %933 = vmatpush3.msra.mxu0 %v482_v0  ;;  %968 = vmatpush3.msra.mxu1 %v514_v2 }
 0x153   :  { %934 = vmatprep.subr.mxu0 %v497_v4  ;;  %969 = vmatprep.subr.mxu1 %v529_v5 }
 0x154   :  { %935 = vmatpush3.msra.mxu0 %v481_v6  ;;  %970 = vmatpush3.msra.mxu1 %v513_v7 }
 0x155   :  { %936 = vmatprep.subr.mxu0 %v496_v8  ;;  %971 = vmatprep.subr.mxu1 %v528_v9 }
 0x156   :  { %937 = vmatpush3.msra.mxu0 %v480_v11  ;;  %972 = vmatpush3.msra.mxu1 %v512_v12 }
 0x157   :  { %938 = vmatprep.subr.mxu0 %v495_v17  ;;  %973 = vmatprep.subr.mxu1 %v527_v18 }
 0x158   :  { %939 = vmatpush3.msra.mxu0 %v479_v19  ;;  %974 = vmatpush3.msra.mxu1 %v511_v20 }
 0x159   :  { %940 = vmatprep.subr.mxu0 %v494_v44  ;;  %975 = vmatprep.subr.mxu1 %v526_v25 }
 0x15a   :  { %941 = vmatpush3.msra.mxu0 %v478_v26  ;;  %976 = vmatpush3.msra.mxu1 %v510_v28 }
 0x15b   :  { %942 = vmatprep.subr.mxu0 %v493_v32  ;;  %977 = vmatprep.subr.mxu1 %v525_v16 }
 0x15c   :  { %943 = vmatpush3.msra.mxu0 %v477_v33  ;;  %978 = vmatpush3.msra.mxu1 %v509_v34 }
 0x15d   :  { %944 = vmatprep.subr.mxu0 %v492_v37  ;;  %979 = vmatprep.subr.mxu1 %v524_v38 }
 0x15e   :  { %945 = vmatpush3.msra.mxu0 %v476_v24  ;;  %980 = vmatpush3.msra.mxu1 %v508_v40 }
 0x15f   :  { %946 = vmatprep.subr.mxu0 %v491_v46  ;;  %981 = vmatprep.subr.mxu1 %v523_v47 }
 0x160   :  { %947 = vmatpush3.msra.mxu0 %v475_v43  ;;  %982 = vmatpush3.msra.mxu1 %v507_v48 }
 0x161   :  { %751 = vmatmul.mubr.f32.vlgmr.msra.gmra.mxu0 %v407_v49  ;;  %821 = vmatmul.mubr.f32.vlgmr.msra.gmra.mxu1 %v409_v50 }
 0x200   :  { %v878_v51 = vpop.f32.mrf.mxu0  ;;  %v913_v52 = vpop.f32.mrf.mxu1 }
 0x202   :  { %v879_v1 = vpop.f32.mrf.mxu0  ;;  %v914_v55 = vpop.f32.mrf.mxu1 }
 0x203   :  { %v880_v53 = vadd.f32 %v879_v1, %v878_v51  ;;  %v915_v59 = vadd.f32 %v914_v55, %v913_v52 }
 0x205   :  { %v613_v56 = vadd.f32 %v880_v53, %v845_v54 }
 0x207   :  { %v683_v62 = vadd.f32 %v915_v59, %v613_v56 }
 0x221   :  { %v948_v57 = vpop.f32.mrf.mxu0  ;;  %v983_v58 = vpop.f32.mrf.mxu1 }
 0x223   :  { %v949_v60 = vpop.f32.mrf.mxu0  ;;  %v984_v61 = vpop.f32.mrf.mxu1 }
 0x224   :  { %v950_v63 = vadd.f32 %v949_v60, %v948_v57  ;;  %v985_v2 = vadd.f32 %v984_v61, %v983_v58 }
 0x226   :  { %v753_v0 = vadd.f32 %v950_v63, %v683_v62 }
 0x228   :  { %v823_v27 = vadd.f32 %v985_v2, %v753_v0 }
 0x22a   :  { %v826_v3 = vmul.f32 2.0, %v823_v27 }
 0x22c   :  { %827 = vst [vmem:[#allocation6] sm:$0xff] %v826_v3 }
 0x22d   :  { %1037 = shalt.err (!%p1034_p9)
}
 0x22e   :  { %837 = dma.vmem_to_hbm [thread:$0]  %s835_s23, 128, %s1255_s5, [#allocation5]  }
 0x22f   :  { %1048 = dma.done.wait [#allocation5], 128  }
 0x230   :  { %1049 = vsyncadd [#allocation5], 4294967168 }
 0x231   :  { %841 = vsyncpa [#allocation4], 1 }
 0x232   :  { %842 = vsyncpa [#allocation5], 1 }

</bundles_post_ra>
